<compile_context>
chip_gen: v7x
topology: tpu7x:2x2x1
jax: 0.10.0
libtpu: 0.0.40
codegen_flags: <defaults>
</compile_context>

<pallas_src>
import functools
import math

import jax
import jax.numpy as jnp
from jax import lax
from jax.experimental import pallas as pl
from jax.experimental.pallas import tpu as pltpu


# ----------------------------- Pallas kernel --------------------------------
def lstm_text_kernel(xw_ref,            # (T*BB, 8H) pre-projected gates, rows t*BB+b
                     whh_ref,           # (4H, 4H)   fwd recurrent weights, rows [H,2H) real
                     wf_ref, wb_ref,    # (4H, LP)   LN-folded FC weights, rows [H,2H) real
                     bias_ref,          # (1, LP)    ln_b @ fc_w.T + fc_b (lane padded)
                     out_ref,           # (BB, LP)
                     *, seq_len, hidden):
    T, H = seq_len, hidden
    H4 = 4 * H
    B = xw_ref.shape[0] // T

    # Hoisted lane constants (computed once, reused by every unrolled step).
    lane = lax.broadcasted_iota(jnp.int32, (B, H4), 1)
    is_g = jnp.logical_and(lane >= 2 * H, lane < 3 * H)          # tanh band (g)
    blend_a = jnp.where(is_g, 1.0, 0.5).astype(jnp.float32)
    blend_b = jnp.where(is_g, 0.0, 0.5).astype(jnp.float32)
    band_h = jnp.logical_and(lane >= H, lane < 2 * H)            # real h/c band

    whh = whh_ref[...]

    def activate(gates):
        # Gate columns were pre-scaled in the wrapper (x0.5 on i/f/o), so one
        # full-width tanh pass gives sigmoid via 0.5*(1 + tanh(x/2)); g lanes
        # (scale 1.0, blend 1/0) pass tanh through unchanged.
        t = jnp.tanh(gates)
        return t * blend_a + blend_b

    def step(a, c):
        # Torch gate band order [i | f | g | o]; real c/h live on the f band
        # (lanes [H, 2H)).  roll(a,H)*roll(a,3H) places i*g on that band
        # irrespective of roll direction; roll(a,2H) places o there.  Junk in
        # the other bands is harmless: whh/wf/wb rows outside [H,2H) are zero
        # and the LayerNorm reductions mask to band_h.
        ig = pltpu.roll(a, shift=H, axis=1) * pltpu.roll(a, shift=3 * H, axis=1)
        o0 = pltpu.roll(a, shift=2 * H, axis=1)
        c_new = a * c + ig                      # band_h: f*c + i*g
        h_new = o0 * jnp.tanh(c_new)            # band_h: o*tanh(c)
        return h_new, c_new

    h = jnp.zeros((B, H4), jnp.float32)
    c = jnp.zeros((B, H4), jnp.float32)
    # Forward direction, fully unrolled (T static & small): only h @ Whh remains
    # on the serial chain (input projection + biases pre-gathered in the wrapper).
    for t in range(T):
        gates = (xw_ref[t * B:(t + 1) * B, 0:H4]
                 + jnp.dot(h, whh, preferred_element_type=jnp.float32))
        h, c = step(activate(gates), c)

    # Backward direction at output index T-1 == its FIRST step from zero state,
    # so only the (pre-projected) x[T-1] term survives; Whh_b drops out.
    h_b, _ = step(activate(xw_ref[(T - 1) * B:T * B, H4:2 * H4]),
                  jnp.zeros((B, H4), jnp.float32))

    # Custom LayerNorm over [h_fwd | h_bwd] (width 2H): torch.std (unbiased),
    # clamp OUTSIDE the sqrt, exact reciprocal.  No (B, 2H) concatenate: masked
    # band reductions combine the two halves' statistics.
    n = 2 * H
    zero = jnp.float32(0.0)
    s1 = jnp.sum(jnp.where(band_h, h + h_b, zero), axis=-1, keepdims=True)
    mu = s1 * (1.0 / n)
    df = jnp.where(band_h, h - mu, zero)
    db = jnp.where(band_h, h_b - mu, zero)
    ssq = jnp.sum(df * df + db * db, axis=-1, keepdims=True)
    sigma = jnp.maximum(jnp.sqrt(ssq * (1.0 / (n - 1))), 1e-6)

    # FC with the LayerNorm affine folded into the (lane-padded, zero-row) FC
    # weights: two accumulated dots, rows scaled by 1/sigma, constant bias.
    acc = (jnp.dot(df, wf_ref[...], preferred_element_type=jnp.float32)
           + jnp.dot(db, wb_ref[...], preferred_element_type=jnp.float32))
    out_ref[...] = acc * (1.0 / sigma) + bias_ref[...]


# ------------------------------- wrapper -------------------------------------
def lstm_text_forward(token_ids, params):
    """token_ids: (B, T) int32 -> logits (B, label_size) float32."""
    B, T = token_ids.shape
    H = params["whh_f"].shape[1]
    L = params["fc_w"].shape[0]
    H4, H8 = 4 * H, 8 * H
    LP = 128                                   # lane-padded label width

    # Batch blocking: biggest block (<=256 rows) that still leaves >=2 grid
    # blocks when the batch allows (v7x has 2 TensorCores; "parallel" axis).
    if B <= 8:
        BB = 8
    else:
        half = -(-B // 2)                      # ceil(B/2)
        BB = min(256, ((half + 7) // 8) * 8)
    B_pad = ((B + BB - 1) // BB) * BB
    G = B_pad // BB

    # Gate pre-scale for sigmoid(x)=0.5*(1+tanh(x/2)): torch order [i,f,g,o];
    # x0.5 on i/f/o columns, x1.0 on g columns.
    gate_scale = jnp.concatenate(
        [jnp.full((2 * H,), 0.5), jnp.ones((H,)), jnp.full((H,), 0.5)]
    ).astype(jnp.float32)

    b_f = params["bih_f"] + params["bhh_f"]
    b_b = params["bih_b"] + params["bhh_b"]

    # Embedding fused with the input projection: tiny (vocab, 8H) table; the
    # kernel's lane-sparse K=E matmul is gone, gather xw rows directly.
    emb = params["embedding"].astype(jnp.float32)
    table = jnp.concatenate(
        [(emb @ params["wih_f"].T + b_f) * gate_scale,
         (emb @ params["wih_b"].T + b_b) * gate_scale], axis=1)      # (V, 8H)
    xw = jnp.take(table, token_ids, axis=0)                          # (B, T, 8H)
    xw = jnp.pad(xw, ((0, B_pad - B), (0, 0), (0, 0)))
    # (B_pad, T, 8H) -> (G, T*BB, 8H): seq-major rows (t*BB + b) inside a block.
    xw = xw.reshape(G, BB, T, H8).transpose(0, 2, 1, 3).reshape(G, T * BB, H8)

    # Forward recurrent weights, zero-padded so the recurrence stays full-width;
    # real rows on the f band [H, 2H), columns pre-scaled like the gates.
    whh_pad = jnp.zeros((H4, H4), jnp.float32).at[H:2 * H, :].set(
        params["whh_f"].T * gate_scale)

    # LayerNorm affine folded into lane-padded FC weights / bias constant.
    fc_wt = params["fc_w"].T                                         # (2H, L)
    w_eff = params["ln_w"][:, None] * fc_wt                          # (2H, L)
    wf = jnp.zeros((H4, LP), jnp.float32).at[H:2 * H, :L].set(w_eff[:H])
    wb = jnp.zeros((H4, LP), jnp.float32).at[H:2 * H, :L].set(w_eff[H:])
    bias = jnp.zeros((1, LP), jnp.float32).at[0, :L].set(
        params["ln_b"] @ fc_wt + params["fc_b"])

    kernel = functools.partial(lstm_text_kernel, seq_len=T, hidden=H)
    rep = lambda g: (0, 0)                     # weights: same block every step

    out = pl.pallas_call(
        kernel,
        out_shape=jax.ShapeDtypeStruct((B_pad, LP), jnp.float32),
        grid=(G,),
        in_specs=[
            pl.BlockSpec((None, T * BB, H8), lambda g: (g, 0, 0)),   # per-block xw
            pl.BlockSpec((H4, H4), rep),
            pl.BlockSpec((H4, LP), rep),
            pl.BlockSpec((H4, LP), rep),
            pl.BlockSpec((1, LP), rep),
        ],
        out_specs=pl.BlockSpec((BB, LP), lambda g: (g, 0)),
        compiler_params=pltpu.CompilerParams(
            dimension_semantics=("parallel",),       # batch blocks -> megacore/2-TC
            vmem_limit_bytes=32 * 1024 * 1024,       # explicit, v7x-safe
        ),
    )(xw, whh_pad, wf, wb, bias)

    return out[:B, :L]


# ------------------------- pure-JAX reference ---------------------------------
def reference_forward(token_ids, params):
    emb = jnp.take(params["embedding"], token_ids, axis=0).astype(jnp.float32)
    x = emb.transpose(1, 0, 2)                                   # (T, B, E)
    T, B, _ = x.shape
    H = params["whh_f"].shape[1]

    def cell(x_t, h, c, wih, whh, b):
        g = x_t @ wih.T + h @ whh.T + b
        i, f, gg, o = jnp.split(g, 4, axis=-1)
        i, f, o = jax.nn.sigmoid(i), jax.nn.sigmoid(f), jax.nn.sigmoid(o)
        c = f * c + i * jnp.tanh(gg)
        return o * jnp.tanh(c), c

    h = c = jnp.zeros((B, H), jnp.float32)
    for t in range(T):
        h, c = cell(x[t], h, c, params["wih_f"], params["whh_f"],
                    params["bih_f"] + params["bhh_f"])
    h_fwd = h
    h = c = jnp.zeros((B, H), jnp.float32)
    h_bwd_last = None
    for t in range(T - 1, -1, -1):
        h, c = cell(x[t], h, c, params["wih_b"], params["whh_b"],
                    params["bih_b"] + params["bhh_b"])
        if t == T - 1:
            h_bwd_last = h                                       # lstm_out[-1], bwd half
    out = jnp.concatenate([h_fwd, h_bwd_last], axis=-1)
    mu = out.mean(-1, keepdims=True)
    var = jnp.sum((out - mu) ** 2, -1, keepdims=True) / (out.shape[-1] - 1)
    sigma = jnp.maximum(jnp.sqrt(var), 1e-6)
    out = (out - mu) / sigma * params["ln_w"] + params["ln_b"]
    return out @ params["fc_w"].T + params["fc_b"]


# ----------------------------- param init ------------------------------------
def init_params(key, vocab_size, embed_size, hidden_size, label_size):
    ks = jax.random.split(key, 10)
    scope = 0.1
    bound = 1.0 / math.sqrt(hidden_size)

    def u(k, shape, b):
        return jax.random.uniform(k, shape, jnp.float32, -b, b)

    H, E = hidden_size, embed_size
    return {
        # nn.Embedding weight (init_weight: uniform(-0.1, 0.1)); padding row is
        # overwritten by uniform_ in the original module too, so plain lookup.
        "embedding": u(ks[0], (vocab_size, E), scope),
        # LSTM layer 0, forward direction (PyTorch gate order i, f, g, o)
        "wih_f": u(ks[1], (4 * H, E), bound),
        "whh_f": u(ks[2], (4 * H, H), bound),
        "bih_f": u(ks[3], (4 * H,), bound),
        "bhh_f": u(ks[4], (4 * H,), bound),
        # LSTM layer 0, backward direction
        "wih_b": u(ks[5], (4 * H, E), bound),
        "whh_b": u(ks[6], (4 * H, H), bound),
        "bih_b": u(ks[7], (4 * H,), bound),
        "bhh_b": u(ks[8], (4 * H,), bound),
        # LayerNorm
        "ln_w": jnp.ones((2 * H,), jnp.float32),
        "ln_b": jnp.zeros((2 * H,), jnp.float32),
        # FC (init_weight: uniform(-0.1, 0.1), bias zero)
        "fc_w": u(ks[9], (label_size, 2 * H), scope),
        "fc_b": jnp.zeros((label_size,), jnp.float32),
    }


# ------------------------------- main -----------------------------------------
if __name__ == "__main__":
    # args: vocab_size=32, embed_size=16, hidden_size=32, num_layers=1,
    #       bidirectional=True, dropout=0.0, label_size=4, PAD=0
    VOCAB, E, H, L = 32, 16, 32, 4
    B, T = 2, 8

    key = jax.random.PRNGKey(0)
    k_params, k_tokens = jax.random.split(key)
    params = init_params(k_params, VOCAB, E, H, L)
    token_ids = jax.random.randint(k_tokens, (B, T), 0, VOCAB, dtype=jnp.int32)

    fwd = jax.jit(lstm_text_forward)
    logits = fwd(token_ids, params)
    jax.block_until_ready(logits)
    assert logits.shape == (B, L) and logits.dtype == jnp.float32

    ref = reference_forward(token_ids, params)
    assert jnp.max(jnp.abs(logits - ref)) < 1e-3, "mismatch vs pure-JAX reference"
    print("KERNEL_OK")
</pallas_src>

<mosaic_0001>
module attributes {stable_mosaic.version = 11 : i64} {
  func.func @lstm_text_kernel(%arg0: i32, %arg1: memref<1x64x256xf32, #tpu.memory_space<vmem>>, %arg2: memref<128x128xf32, #tpu.memory_space<vmem>>, %arg3: memref<128x128xf32, #tpu.memory_space<vmem>>, %arg4: memref<128x128xf32, #tpu.memory_space<vmem>>, %arg5: memref<1x128xf32, #tpu.memory_space<vmem>>, %arg6: memref<8x128xf32, #tpu.memory_space<vmem>>) attributes {dimension_semantics = [#tpu.dimension_semantics<parallel>], iteration_bounds = array<i64: 1>, scalar_prefetch = 0 : i64, scratch_operands = 0 : i64, tpu.core_type = #tpu.core_type<tc>, window_params = [{transform_indices = @transform_0, window_bounds = array<i64: 1, 64, 256>}, {pipeline_mode = #tpu.pipeline_mode<synchronous>, transform_indices = @transform_1, window_bounds = array<i64: 128, 128>}, {pipeline_mode = #tpu.pipeline_mode<synchronous>, transform_indices = @transform_2, window_bounds = array<i64: 128, 128>}, {pipeline_mode = #tpu.pipeline_mode<synchronous>, transform_indices = @transform_3, window_bounds = array<i64: 128, 128>}, {pipeline_mode = #tpu.pipeline_mode<synchronous>, transform_indices = @transform_4, window_bounds = array<i64: 1, 128>}, {transform_indices = @transform_5, window_bounds = array<i64: 8, 128>}]} {
    %0 = tpu.iota {dimensions = array<i32: 1>} : vector<8x128xi32>
    %c64_i32 = arith.constant 64 : i32
    %1 = vector.broadcast %c64_i32 : i32 to vector<8x128xi32>
    %2 = arith.cmpi sge, %0, %1 : vector<8x128xi32>
    %c96_i32 = arith.constant 96 : i32
    %3 = vector.broadcast %c96_i32 : i32 to vector<8x128xi32>
    %4 = arith.cmpi slt, %0, %3 : vector<8x128xi32>
    %5 = arith.andi %2, %4 : vector<8x128xi1>
    %cst = arith.constant 1.000000e+00 : f32
    %cst_0 = arith.constant 5.000000e-01 : f32
    %6 = vector.broadcast %cst : f32 to vector<8x128xf32>
    %7 = vector.broadcast %cst_0 : f32 to vector<8x128xf32>
    %8 = arith.select %5, %6, %7 : vector<8x128xi1>, vector<8x128xf32>
    %cst_1 = arith.constant 0.000000e+00 : f32
    %cst_2 = arith.constant 5.000000e-01 : f32
    %9 = vector.broadcast %cst_1 : f32 to vector<8x128xf32>
    %10 = vector.broadcast %cst_2 : f32 to vector<8x128xf32>
    %11 = arith.select %5, %9, %10 : vector<8x128xi1>, vector<8x128xf32>
    %c32_i32 = arith.constant 32 : i32
    %12 = vector.broadcast %c32_i32 : i32 to vector<8x128xi32>
    %13 = arith.cmpi sge, %0, %12 : vector<8x128xi32>
    %c64_i32_3 = arith.constant 64 : i32
    %14 = vector.broadcast %c64_i32_3 : i32 to vector<8x128xi32>
    %15 = arith.cmpi slt, %0, %14 : vector<8x128xi32>
    %16 = arith.andi %13, %15 : vector<8x128xi1>
    %c0 = arith.constant 0 : index
    %c0_4 = arith.constant 0 : index
    %17 = vector.load %arg2[%c0, %c0_4] : memref<128x128xf32, #tpu.memory_space<vmem>>, vector<128x128xf32>
    %cst_5 = arith.constant 0.000000e+00 : f32
    %18 = vector.broadcast %cst_5 : f32 to vector<8x128xf32>
    %cst_6 = arith.constant 0.000000e+00 : f32
    %19 = vector.broadcast %cst_6 : f32 to vector<8x128xf32>
    %c0_7 = arith.constant 0 : index
    %c0_8 = arith.constant 0 : index
    %c0_9 = arith.constant 0 : index
    %20 = vector.load %arg1[%c0_7, %c0_8, %c0_9] : memref<1x64x256xf32, #tpu.memory_space<vmem>>, vector<1x8x128xf32>
    %21 = vector.shape_cast %20 : vector<1x8x128xf32> to vector<8x128xf32>
    %cst_10 = arith.constant dense<0.000000e+00> : vector<8x128xf32>
    %22 = tpu.matmul %18, %17, %cst_10 {dimension_numbers = #tpu.dot_dimension_numbers<[1], [0], [0], [1], [0, 0, 1, 1], [], []>} : vector<8x128xf32>, vector<128x128xf32>, vector<8x128xf32> -> vector<8x128xf32>
    %23 = arith.addf %21, %22 : vector<8x128xf32>
    %24 = math.tanh %23 : vector<8x128xf32>
    %25 = arith.mulf %24, %8 : vector<8x128xf32>
    %26 = arith.addf %25, %11 : vector<8x128xf32>
    %c32_i32_11 = arith.constant 32 : i32
    %27 = tpu.dynamic_rotate %26 by %c32_i32_11 dim 1 : vector<8x128xf32>, i32 -> vector<8x128xf32>
    %c96_i32_12 = arith.constant 96 : i32
    %28 = tpu.dynamic_rotate %26 by %c96_i32_12 dim 1 : vector<8x128xf32>, i32 -> vector<8x128xf32>
    %29 = arith.mulf %27, %28 : vector<8x128xf32>
    %c64_i32_13 = arith.constant 64 : i32
    %30 = tpu.dynamic_rotate %26 by %c64_i32_13 dim 1 : vector<8x128xf32>, i32 -> vector<8x128xf32>
    %31 = arith.mulf %26, %19 : vector<8x128xf32>
    %32 = arith.addf %31, %29 : vector<8x128xf32>
    %33 = math.tanh %32 : vector<8x128xf32>
    %34 = arith.mulf %30, %33 : vector<8x128xf32>
    %c0_14 = arith.constant 0 : index
    %c8 = arith.constant 8 : index
    %c0_15 = arith.constant 0 : index
    %35 = vector.load %arg1[%c0_14, %c8, %c0_15] : memref<1x64x256xf32, #tpu.memory_space<vmem>>, vector<1x8x128xf32>
    %36 = vector.shape_cast %35 : vector<1x8x128xf32> to vector<8x128xf32>
    %cst_16 = arith.constant dense<0.000000e+00> : vector<8x128xf32>
    %37 = tpu.matmul %34, %17, %cst_16 {dimension_numbers = #tpu.dot_dimension_numbers<[1], [0], [0], [1], [0, 0, 1, 1], [], []>} : vector<8x128xf32>, vector<128x128xf32>, vector<8x128xf32> -> vector<8x128xf32>
    %38 = arith.addf %36, %37 : vector<8x128xf32>
    %39 = math.tanh %38 : vector<8x128xf32>
    %40 = arith.mulf %39, %8 : vector<8x128xf32>
    %41 = arith.addf %40, %11 : vector<8x128xf32>
    %c32_i32_17 = arith.constant 32 : i32
    %42 = tpu.dynamic_rotate %41 by %c32_i32_17 dim 1 : vector<8x128xf32>, i32 -> vector<8x128xf32>
    %c96_i32_18 = arith.constant 96 : i32
    %43 = tpu.dynamic_rotate %41 by %c96_i32_18 dim 1 : vector<8x128xf32>, i32 -> vector<8x128xf32>
    %44 = arith.mulf %42, %43 : vector<8x128xf32>
    %c64_i32_19 = arith.constant 64 : i32
    %45 = tpu.dynamic_rotate %41 by %c64_i32_19 dim 1 : vector<8x128xf32>, i32 -> vector<8x128xf32>
    %46 = arith.mulf %41, %32 : vector<8x128xf32>
    %47 = arith.addf %46, %44 : vector<8x128xf32>
    %48 = math.tanh %47 : vector<8x128xf32>
    %49 = arith.mulf %45, %48 : vector<8x128xf32>
    %c0_20 = arith.constant 0 : index
    %c16 = arith.constant 16 : index
    %c0_21 = arith.constant 0 : index
    %50 = vector.load %arg1[%c0_20, %c16, %c0_21] : memref<1x64x256xf32, #tpu.memory_space<vmem>>, vector<1x8x128xf32>
    %51 = vector.shape_cast %50 : vector<1x8x128xf32> to vector<8x128xf32>
    %cst_22 = arith.constant dense<0.000000e+00> : vector<8x128xf32>
    %52 = tpu.matmul %49, %17, %cst_22 {dimension_numbers = #tpu.dot_dimension_numbers<[1], [0], [0], [1], [0, 0, 1, 1], [], []>} : vector<8x128xf32>, vector<128x128xf32>, vector<8x128xf32> -> vector<8x128xf32>
    %53 = arith.addf %51, %52 : vector<8x128xf32>
    %54 = math.tanh %53 : vector<8x128xf32>
    %55 = arith.mulf %54, %8 : vector<8x128xf32>
    %56 = arith.addf %55, %11 : vector<8x128xf32>
    %c32_i32_23 = arith.constant 32 : i32
    %57 = tpu.dynamic_rotate %56 by %c32_i32_23 dim 1 : vector<8x128xf32>, i32 -> vector<8x128xf32>
    %c96_i32_24 = arith.constant 96 : i32
    %58 = tpu.dynamic_rotate %56 by %c96_i32_24 dim 1 : vector<8x128xf32>, i32 -> vector<8x128xf32>
    %59 = arith.mulf %57, %58 : vector<8x128xf32>
    %c64_i32_25 = arith.constant 64 : i32
    %60 = tpu.dynamic_rotate %56 by %c64_i32_25 dim 1 : vector<8x128xf32>, i32 -> vector<8x128xf32>
    %61 = arith.mulf %56, %47 : vector<8x128xf32>
    %62 = arith.addf %61, %59 : vector<8x128xf32>
    %63 = math.tanh %62 : vector<8x128xf32>
    %64 = arith.mulf %60, %63 : vector<8x128xf32>
    %c0_26 = arith.constant 0 : index
    %c24 = arith.constant 24 : index
    %c0_27 = arith.constant 0 : index
    %65 = vector.load %arg1[%c0_26, %c24, %c0_27] : memref<1x64x256xf32, #tpu.memory_space<vmem>>, vector<1x8x128xf32>
    %66 = vector.shape_cast %65 : vector<1x8x128xf32> to vector<8x128xf32>
    %cst_28 = arith.constant dense<0.000000e+00> : vector<8x128xf32>
    %67 = tpu.matmul %64, %17, %cst_28 {dimension_numbers = #tpu.dot_dimension_numbers<[1], [0], [0], [1], [0, 0, 1, 1], [], []>} : vector<8x128xf32>, vector<128x128xf32>, vector<8x128xf32> -> vector<8x128xf32>
    %68 = arith.addf %66, %67 : vector<8x128xf32>
    %69 = math.tanh %68 : vector<8x128xf32>
    %70 = arith.mulf %69, %8 : vector<8x128xf32>
    %71 = arith.addf %70, %11 : vector<8x128xf32>
    %c32_i32_29 = arith.constant 32 : i32
    %72 = tpu.dynamic_rotate %71 by %c32_i32_29 dim 1 : vector<8x128xf32>, i32 -> vector<8x128xf32>
    %c96_i32_30 = arith.constant 96 : i32
    %73 = tpu.dynamic_rotate %71 by %c96_i32_30 dim 1 : vector<8x128xf32>, i32 -> vector<8x128xf32>
    %74 = arith.mulf %72, %73 : vector<8x128xf32>
    %c64_i32_31 = arith.constant 64 : i32
    %75 = tpu.dynamic_rotate %71 by %c64_i32_31 dim 1 : vector<8x128xf32>, i32 -> vector<8x128xf32>
    %76 = arith.mulf %71, %62 : vector<8x128xf32>
    %77 = arith.addf %76, %74 : vector<8x128xf32>
    %78 = math.tanh %77 : vector<8x128xf32>
    %79 = arith.mulf %75, %78 : vector<8x128xf32>
    %c0_32 = arith.constant 0 : index
    %c32 = arith.constant 32 : index
    %c0_33 = arith.constant 0 : index
    %80 = vector.load %arg1[%c0_32, %c32, %c0_33] : memref<1x64x256xf32, #tpu.memory_space<vmem>>, vector<1x8x128xf32>
    %81 = vector.shape_cast %80 : vector<1x8x128xf32> to vector<8x128xf32>
    %cst_34 = arith.constant dense<0.000000e+00> : vector<8x128xf32>
    %82 = tpu.matmul %79, %17, %cst_34 {dimension_numbers = #tpu.dot_dimension_numbers<[1], [0], [0], [1], [0, 0, 1, 1], [], []>} : vector<8x128xf32>, vector<128x128xf32>, vector<8x128xf32> -> vector<8x128xf32>
    %83 = arith.addf %81, %82 : vector<8x128xf32>
    %84 = math.tanh %83 : vector<8x128xf32>
    %85 = arith.mulf %84, %8 : vector<8x128xf32>
    %86 = arith.addf %85, %11 : vector<8x128xf32>
    %c32_i32_35 = arith.constant 32 : i32
    %87 = tpu.dynamic_rotate %86 by %c32_i32_35 dim 1 : vector<8x128xf32>, i32 -> vector<8x128xf32>
    %c96_i32_36 = arith.constant 96 : i32
    %88 = tpu.dynamic_rotate %86 by %c96_i32_36 dim 1 : vector<8x128xf32>, i32 -> vector<8x128xf32>
    %89 = arith.mulf %87, %88 : vector<8x128xf32>
    %c64_i32_37 = arith.constant 64 : i32
    %90 = tpu.dynamic_rotate %86 by %c64_i32_37 dim 1 : vector<8x128xf32>, i32 -> vector<8x128xf32>
    %91 = arith.mulf %86, %77 : vector<8x128xf32>
    %92 = arith.addf %91, %89 : vector<8x128xf32>
    %93 = math.tanh %92 : vector<8x128xf32>
    %94 = arith.mulf %90, %93 : vector<8x128xf32>
    %c0_38 = arith.constant 0 : index
    %c40 = arith.constant 40 : index
    %c0_39 = arith.constant 0 : index
    %95 = vector.load %arg1[%c0_38, %c40, %c0_39] : memref<1x64x256xf32, #tpu.memory_space<vmem>>, vector<1x8x128xf32>
    %96 = vector.shape_cast %95 : vector<1x8x128xf32> to vector<8x128xf32>
    %cst_40 = arith.constant dense<0.000000e+00> : vector<8x128xf32>
    %97 = tpu.matmul %94, %17, %cst_40 {dimension_numbers = #tpu.dot_dimension_numbers<[1], [0], [0], [1], [0, 0, 1, 1], [], []>} : vector<8x128xf32>, vector<128x128xf32>, vector<8x128xf32> -> vector<8x128xf32>
    %98 = arith.addf %96, %97 : vector<8x128xf32>
    %99 = math.tanh %98 : vector<8x128xf32>
    %100 = arith.mulf %99, %8 : vector<8x128xf32>
    %101 = arith.addf %100, %11 : vector<8x128xf32>
    %c32_i32_41 = arith.constant 32 : i32
    %102 = tpu.dynamic_rotate %101 by %c32_i32_41 dim 1 : vector<8x128xf32>, i32 -> vector<8x128xf32>
    %c96_i32_42 = arith.constant 96 : i32
    %103 = tpu.dynamic_rotate %101 by %c96_i32_42 dim 1 : vector<8x128xf32>, i32 -> vector<8x128xf32>
    %104 = arith.mulf %102, %103 : vector<8x128xf32>
    %c64_i32_43 = arith.constant 64 : i32
    %105 = tpu.dynamic_rotate %101 by %c64_i32_43 dim 1 : vector<8x128xf32>, i32 -> vector<8x128xf32>
    %106 = arith.mulf %101, %92 : vector<8x128xf32>
    %107 = arith.addf %106, %104 : vector<8x128xf32>
    %108 = math.tanh %107 : vector<8x128xf32>
    %109 = arith.mulf %105, %108 : vector<8x128xf32>
    %c0_44 = arith.constant 0 : index
    %c48 = arith.constant 48 : index
    %c0_45 = arith.constant 0 : index
    %110 = vector.load %arg1[%c0_44, %c48, %c0_45] : memref<1x64x256xf32, #tpu.memory_space<vmem>>, vector<1x8x128xf32>
    %111 = vector.shape_cast %110 : vector<1x8x128xf32> to vector<8x128xf32>
    %cst_46 = arith.constant dense<0.000000e+00> : vector<8x128xf32>
    %112 = tpu.matmul %109, %17, %cst_46 {dimension_numbers = #tpu.dot_dimension_numbers<[1], [0], [0], [1], [0, 0, 1, 1], [], []>} : vector<8x128xf32>, vector<128x128xf32>, vector<8x128xf32> -> vector<8x128xf32>
    %113 = arith.addf %111, %112 : vector<8x128xf32>
    %114 = math.tanh %113 : vector<8x128xf32>
    %115 = arith.mulf %114, %8 : vector<8x128xf32>
    %116 = arith.addf %115, %11 : vector<8x128xf32>
    %c32_i32_47 = arith.constant 32 : i32
    %117 = tpu.dynamic_rotate %116 by %c32_i32_47 dim 1 : vector<8x128xf32>, i32 -> vector<8x128xf32>
    %c96_i32_48 = arith.constant 96 : i32
    %118 = tpu.dynamic_rotate %116 by %c96_i32_48 dim 1 : vector<8x128xf32>, i32 -> vector<8x128xf32>
    %119 = arith.mulf %117, %118 : vector<8x128xf32>
    %c64_i32_49 = arith.constant 64 : i32
    %120 = tpu.dynamic_rotate %116 by %c64_i32_49 dim 1 : vector<8x128xf32>, i32 -> vector<8x128xf32>
    %121 = arith.mulf %116, %107 : vector<8x128xf32>
    %122 = arith.addf %121, %119 : vector<8x128xf32>
    %123 = math.tanh %122 : vector<8x128xf32>
    %124 = arith.mulf %120, %123 : vector<8x128xf32>
    %c0_50 = arith.constant 0 : index
    %c56 = arith.constant 56 : index
    %c0_51 = arith.constant 0 : index
    %125 = vector.load %arg1[%c0_50, %c56, %c0_51] : memref<1x64x256xf32, #tpu.memory_space<vmem>>, vector<1x8x128xf32>
    %126 = vector.shape_cast %125 : vector<1x8x128xf32> to vector<8x128xf32>
    %cst_52 = arith.constant dense<0.000000e+00> : vector<8x128xf32>
    %127 = tpu.matmul %124, %17, %cst_52 {dimension_numbers = #tpu.dot_dimension_numbers<[1], [0], [0], [1], [0, 0, 1, 1], [], []>} : vector<8x128xf32>, vector<128x128xf32>, vector<8x128xf32> -> vector<8x128xf32>
    %128 = arith.addf %126, %127 : vector<8x128xf32>
    %129 = math.tanh %128 : vector<8x128xf32>
    %130 = arith.mulf %129, %8 : vector<8x128xf32>
    %131 = arith.addf %130, %11 : vector<8x128xf32>
    %c32_i32_53 = arith.constant 32 : i32
    %132 = tpu.dynamic_rotate %131 by %c32_i32_53 dim 1 : vector<8x128xf32>, i32 -> vector<8x128xf32>
    %c96_i32_54 = arith.constant 96 : i32
    %133 = tpu.dynamic_rotate %131 by %c96_i32_54 dim 1 : vector<8x128xf32>, i32 -> vector<8x128xf32>
    %134 = arith.mulf %132, %133 : vector<8x128xf32>
    %c64_i32_55 = arith.constant 64 : i32
    %135 = tpu.dynamic_rotate %131 by %c64_i32_55 dim 1 : vector<8x128xf32>, i32 -> vector<8x128xf32>
    %136 = arith.mulf %131, %122 : vector<8x128xf32>
    %137 = arith.addf %136, %134 : vector<8x128xf32>
    %138 = math.tanh %137 : vector<8x128xf32>
    %139 = arith.mulf %135, %138 : vector<8x128xf32>
    %c0_56 = arith.constant 0 : index
    %c56_57 = arith.constant 56 : index
    %c128 = arith.constant 128 : index
    %140 = vector.load %arg1[%c0_56, %c56_57, %c128] : memref<1x64x256xf32, #tpu.memory_space<vmem>>, vector<1x8x128xf32>
    %141 = vector.shape_cast %140 : vector<1x8x128xf32> to vector<8x128xf32>
    %142 = math.tanh %141 : vector<8x128xf32>
    %143 = arith.mulf %142, %8 : vector<8x128xf32>
    %144 = arith.addf %143, %11 : vector<8x128xf32>
    %cst_58 = arith.constant 0.000000e+00 : f32
    %145 = vector.broadcast %cst_58 : f32 to vector<8x128xf32>
    %c32_i32_59 = arith.constant 32 : i32
    %146 = tpu.dynamic_rotate %144 by %c32_i32_59 dim 1 : vector<8x128xf32>, i32 -> vector<8x128xf32>
    %c96_i32_60 = arith.constant 96 : i32
    %147 = tpu.dynamic_rotate %144 by %c96_i32_60 dim 1 : vector<8x128xf32>, i32 -> vector<8x128xf32>
    %148 = arith.mulf %146, %147 : vector<8x128xf32>
    %c64_i32_61 = arith.constant 64 : i32
    %149 = tpu.dynamic_rotate %144 by %c64_i32_61 dim 1 : vector<8x128xf32>, i32 -> vector<8x128xf32>
    %150 = arith.mulf %144, %145 : vector<8x128xf32>
    %151 = arith.addf %150, %148 : vector<8x128xf32>
    %152 = math.tanh %151 : vector<8x128xf32>
    %153 = arith.mulf %149, %152 : vector<8x128xf32>
    %154 = arith.addf %139, %153 : vector<8x128xf32>
    %cst_62 = arith.constant 0.000000e+00 : f32
    %155 = vector.broadcast %cst_62 : f32 to vector<8x128xf32>
    %156 = arith.select %16, %154, %155 : vector<8x128xi1>, vector<8x128xf32>
    %cst_63 = arith.constant dense<0.000000e+00> : vector<8xf32>
    %157 = vector.multi_reduction <add>, %156, %cst_63 [1] : vector<8x128xf32> to vector<8xf32>
    %158 = vector.shape_cast %157 : vector<8xf32> to vector<8x1xf32>
    %cst_64 = arith.constant 1.562500e-02 : f32
    %159 = vector.broadcast %cst_64 : f32 to vector<8x1xf32>
    %160 = arith.mulf %158, %159 : vector<8x1xf32>
    %161 = vector.broadcast %160 : vector<8x1xf32> to vector<8x128xf32>
    %162 = arith.subf %139, %161 : vector<8x128xf32>
    %cst_65 = arith.constant 0.000000e+00 : f32
    %163 = vector.broadcast %cst_65 : f32 to vector<8x128xf32>
    %164 = arith.select %16, %162, %163 : vector<8x128xi1>, vector<8x128xf32>
    %165 = vector.broadcast %160 : vector<8x1xf32> to vector<8x128xf32>
    %166 = arith.subf %153, %165 : vector<8x128xf32>
    %cst_66 = arith.constant 0.000000e+00 : f32
    %167 = vector.broadcast %cst_66 : f32 to vector<8x128xf32>
    %168 = arith.select %16, %166, %167 : vector<8x128xi1>, vector<8x128xf32>
    %169 = arith.mulf %164, %164 : vector<8x128xf32>
    %170 = arith.mulf %168, %168 : vector<8x128xf32>
    %171 = arith.addf %169, %170 : vector<8x128xf32>
    %cst_67 = arith.constant dense<0.000000e+00> : vector<8xf32>
    %172 = vector.multi_reduction <add>, %171, %cst_67 [1] : vector<8x128xf32> to vector<8xf32>
    %173 = vector.shape_cast %172 : vector<8xf32> to vector<8x1xf32>
    %cst_68 = arith.constant 0.0158730168 : f32
    %174 = vector.broadcast %cst_68 : f32 to vector<8x1xf32>
    %175 = arith.mulf %173, %174 : vector<8x1xf32>
    %176 = math.sqrt %175 : vector<8x1xf32>
    %cst_69 = arith.constant 9.99999997E-7 : f32
    %177 = vector.broadcast %cst_69 : f32 to vector<8x1xf32>
    %178 = arith.maximumf %176, %177 : vector<8x1xf32>
    %c0_70 = arith.constant 0 : index
    %c0_71 = arith.constant 0 : index
    %179 = vector.load %arg3[%c0_70, %c0_71] : memref<128x128xf32, #tpu.memory_space<vmem>>, vector<128x128xf32>
    %cst_72 = arith.constant dense<0.000000e+00> : vector<8x128xf32>
    %180 = tpu.matmul %164, %179, %cst_72 {dimension_numbers = #tpu.dot_dimension_numbers<[1], [0], [0], [1], [0, 0, 1, 1], [], []>} : vector<8x128xf32>, vector<128x128xf32>, vector<8x128xf32> -> vector<8x128xf32>
    %c0_73 = arith.constant 0 : index
    %c0_74 = arith.constant 0 : index
    %181 = vector.load %arg4[%c0_73, %c0_74] : memref<128x128xf32, #tpu.memory_space<vmem>>, vector<128x128xf32>
    %cst_75 = arith.constant dense<0.000000e+00> : vector<8x128xf32>
    %182 = tpu.matmul %168, %181, %cst_75 {dimension_numbers = #tpu.dot_dimension_numbers<[1], [0], [0], [1], [0, 0, 1, 1], [], []>} : vector<8x128xf32>, vector<128x128xf32>, vector<8x128xf32> -> vector<8x128xf32>
    %183 = arith.addf %180, %182 : vector<8x128xf32>
    %cst_76 = arith.constant 1.000000e+00 : f32
    %184 = vector.broadcast %cst_76 : f32 to vector<8x1xf32>
    %185 = arith.divf %184, %178 : vector<8x1xf32>
    %186 = vector.broadcast %185 : vector<8x1xf32> to vector<8x128xf32>
    %187 = arith.mulf %183, %186 : vector<8x128xf32>
    %c0_77 = arith.constant 0 : index
    %c0_78 = arith.constant 0 : index
    %188 = vector.load %arg5[%c0_77, %c0_78] : memref<1x128xf32, #tpu.memory_space<vmem>>, vector<1x128xf32>
    %189 = vector.broadcast %188 : vector<1x128xf32> to vector<8x128xf32>
    %190 = arith.addf %187, %189 : vector<8x128xf32>
    %c0_79 = arith.constant 0 : index
    %c0_80 = arith.constant 0 : index
    %191 = vector.load %arg6[%c0_79, %c0_80] : memref<8x128xf32, #tpu.memory_space<vmem>>, vector<8x128xf32>
    tpu.vector_store %arg6[%c0_79, %c0_80], %190 {strides = array<i32>} : memref<8x128xf32, #tpu.memory_space<vmem>>, vector<8x128xf32>,
    return
  }
  func.func @transform_0(%arg0: i32) -> (i32, i32, i32) {
    %c0_i32 = arith.constant 0 : i32
    %c0_i32_0 = arith.constant 0 : i32
    %c0_i32_1 = arith.constant 0 : i32
    return %arg0, %c0_i32, %c0_i32_0 : i32, i32, i32
  }
  func.func @transform_1(%arg0: i32) -> (i32, i32) {
    %c0_i32 = arith.constant 0 : i32
    %c0_i32_0 = arith.constant 0 : i32
    %c0_i32_1 = arith.constant 0 : i32
    return %c0_i32, %c0_i32_0 : i32, i32
  }
  func.func @transform_2(%arg0: i32) -> (i32, i32) {
    %c0_i32 = arith.constant 0 : i32
    %c0_i32_0 = arith.constant 0 : i32
    %c0_i32_1 = arith.constant 0 : i32
    return %c0_i32, %c0_i32_0 : i32, i32
  }
  func.func @transform_3(%arg0: i32) -> (i32, i32) {
    %c0_i32 = arith.constant 0 : i32
    %c0_i32_0 = arith.constant 0 : i32
    %c0_i32_1 = arith.constant 0 : i32
    return %c0_i32, %c0_i32_0 : i32, i32
  }
  func.func @transform_4(%arg0: i32) -> (i32, i32) {
    %c0_i32 = arith.constant 0 : i32
    %c0_i32_0 = arith.constant 0 : i32
    %c0_i32_1 = arith.constant 0 : i32
    return %c0_i32, %c0_i32_0 : i32, i32
  }
  func.func @transform_5(%arg0: i32) -> (i32, i32) {
    %c0_i32 = arith.constant 0 : i32
    %c0_i32_0 = arith.constant 0 : i32
    return %arg0, %c0_i32 : i32, i32
  }
}

</mosaic_0001>

<bundles_post_ra>
// kernel: lstm_text_forward.1
= control target key start
LH: loop header
LB: loop body
LE: loop exit
PB: predicated region body
PF: predicated region fallthrough
CT: control target
= control target key end

     0   :  { %v1772_v0 = vmov 0.0|0.0   ;;  %vm1773_vm0 = vmmov 0   ;;  %v1774_v4 = vmov 0.0   ;;  %v20_v26 = vlaneseq  ;;  %s1776_s26 = smov 64   ;;  %s1777_s27 = smov 32   ;;  %s2240_s1 = inlined_call_operand.vmem [shape: f32[128,128], index: 1, kind: input, shape index: {}]   ;;  %s2241_s0 = inlined_call_operand.vmem [shape: f32[1,64,256], index: 0, kind: input, shape index: {}]   ;;  %s2242_s3 = inlined_call_operand.vmem [shape: f32[128,128], index: 3, kind: input, shape index: {}]   ;;  %s2243_s2 = inlined_call_operand.vmem [shape: f32[128,128], index: 2, kind: input, shape index: {}]   ;;  %s2244_s4 = inlined_call_operand.vmem [shape: f32[1,128], index: 4, kind: input, shape index: {}]   ;;  %s2245_s5 = inlined_call_operand.vmem [shape: f32[8,128], index: 5, kind: output, shape index: {}]  }
   0x1   :  { %1483 = vmatprep.subr.bf16.mxu1 %v1772_v0  ;;  %v30_v1 = vld [vmem:[%s2240_s1] sm:$0xff]  ;;  %v31_v2 = vld [vmem:[%s2240_s1 + $0x8] sm:$0xff]  ;;  %v32_v3 = vld [vmem:[%s2240_s1 + $0x10] sm:$0xff]  ;;  %1165 = vmatprep.mubr.msk.f32.mxu1 %vm1773_vm0, %v1774_v4  ;;  %v1775_v32 = vmov 0.5   ;;  %s1778_s28 = smov 96  }
   0x2   :  { %v1821_v5 = vpack.c.bf16 %v31_v2, %v30_v1  ;;  %v33_v6 = vld [vmem:[%s2240_s1 + $0x18] sm:$0xff]  ;;  %1531 = vmatprep.subr.bf16.mxu0 %v1772_v0  ;;  %1235 = vmatprep.mubr.msk.f32.mxu0 %vm1773_vm0, %v1774_v4  ;;  %v34_v8 = vld [vmem:[%s2240_s1 + $0x20] sm:$0xff]  ;;  %v35_v9 = vld [vmem:[%s2240_s1 + $0x28] sm:$0xff]  ;;  %v1933_v31 = vand.u32 127, %v20_v26 }
   0x3   :  { %v1830_v7 = vpack.c.bf16 %v33_v6, %v32_v3  ;;  %v1842_v10 = vpack.c.bf16 %v35_v9, %v34_v8  ;;  %v36_v11 = vld [vmem:[%s2240_s1 + $0x30] sm:$0xff]  ;;  %v37_v12 = vld [vmem:[%s2240_s1 + $0x38] sm:$0xff]  ;;  %v38_v14 = vld [vmem:[%s2240_s1 + $0x40] sm:$0xff] }
   0x4   :  { %1485 = vmatpush3.bf16.msra.mxu1 %v1821_v5  ;;  %1533 = vmatpush3.bf16.msra.mxu0 %v1821_v5  ;;  %v1854_v13 = vpack.c.bf16 %v37_v12, %v36_v11  ;;  %v39_v15 = vld [vmem:[%s2240_s1 + $0x48] sm:$0xff]  ;;  %v40_v17 = vld [vmem:[%s2240_s1 + $0x50] sm:$0xff]  ;;  %v41_v18 = vld [vmem:[%s2240_s1 + $0x58] sm:$0xff]  ;;  %vm22_vm1 = vcmp.ge.s32.totalorder %v1933_v31, 64  ;;  %vm23_vm2 = vcmp.lt.s32.totalorder %v1933_v31, 96  ;;  %vm27_vm4 = vcmp.ge.s32.totalorder %v1933_v31, 32 }
   0x5   :  { %1486 = vmatprep.subr.bf16.mxu1 %v1772_v0  ;;  %1534 = vmatprep.subr.bf16.mxu0 %v1772_v0  ;;  %v1866_v16 = vpack.c.bf16 %v39_v15, %v38_v14  ;;  %v1878_v19 = vpack.c.bf16 %v41_v18, %v40_v17  ;;  %v42_v20 = vld [vmem:[%s2240_s1 + $0x60] sm:$0xff]  ;;  %v43_v21 = vld [vmem:[%s2240_s1 + $0x68] sm:$0xff]  ;;  %v44_v23 = vld [vmem:[%s2240_s1 + $0x70] sm:$0xff]  ;;  %vm28_vm5 = vcmp.lt.s32.totalorder %v1933_v31, 64 }
   0x6   :  { %v1890_v22 = vpack.c.bf16 %v43_v21, %v42_v20  ;;  %v45_v24 = vld [vmem:[%s2240_s1 + $0x78] sm:$0xff]  ;;  %v46_v27 = vld [vmem:[%s2241_s0] sm:$0xff]  ;;  %vm24_vm3 = vmand %vm22_vm1, %vm23_vm2 }
   0x7   :  { %v1902_v25 = vpack.c.bf16 %v45_v24, %v44_v23  ;;  %v1937_v33 = vsel %vm24_vm3, 1.0, %v1775_v32  ;;  %v1939_v35 = vsel %vm24_vm3, 0.0, %v1775_v32  ;;  %v132_v46 = vld [vmem:[%s2241_s0 + $0x10] sm:$0xff]  ;;  %v218_v61 = vld [vmem:[%s2241_s0 + $0x20] sm:$0xff]  ;;  %vm2156_vm6 = vmand %vm27_vm4, %vm28_vm5 }
   0x8   :  { %1488 = vmatpush3.bf16.msra.mxu1 %v1830_v7  ;;  %1536 = vmatpush3.bf16.msra.mxu0 %v1830_v7  ;;  %v304_v20 = vld [vmem:[%s2241_s0 + $0x30] sm:$0xff]  ;;  %v803_v31 = vld [vmem:[%s2242_s3 + $0x78] sm:$0xff] }
   0x9   :  { %1489 = vmatprep.subr.bf16.mxu1 %v1772_v0  ;;  %1537 = vmatprep.subr.bf16.mxu0 %v1772_v0 }
   0xc   :  { %1491 = vmatpush3.bf16.msra.mxu1 %v1842_v10  ;;  %1539 = vmatpush3.bf16.msra.mxu0 %v1842_v10 }
   0xd   :  { %1492 = vmatprep.subr.bf16.mxu1 %v1772_v0  ;;  %1540 = vmatprep.subr.bf16.mxu0 %v1772_v0 }
  0x10   :  { %1494 = vmatpush3.bf16.msra.mxu1 %v1854_v13  ;;  %1542 = vmatpush3.bf16.msra.mxu0 %v1854_v13 }
  0x11   :  { %1495 = vmatprep.subr.bf16.mxu1 %v1772_v0  ;;  %1543 = vmatprep.subr.bf16.mxu0 %v1772_v0 }
  0x14   :  { %1497 = vmatpush3.bf16.msra.mxu1 %v1866_v16  ;;  %1545 = vmatpush3.bf16.msra.mxu0 %v1866_v16 }
  0x15   :  { %1498 = vmatprep.subr.bf16.mxu1 %v1772_v0  ;;  %1546 = vmatprep.subr.bf16.mxu0 %v1772_v0 }
  0x18   :  { %1500 = vmatpush3.bf16.msra.mxu1 %v1878_v19  ;;  %1548 = vmatpush3.bf16.msra.mxu0 %v1878_v19 }
  0x19   :  { %1501 = vmatprep.subr.bf16.mxu1 %v1772_v0  ;;  %1549 = vmatprep.subr.bf16.mxu0 %v1772_v0 }
  0x1c   :  { %1503 = vmatpush3.bf16.msra.mxu1 %v1890_v22  ;;  %1551 = vmatpush3.bf16.msra.mxu0 %v1890_v22 }
  0x1d   :  { %1504 = vmatprep.subr.bf16.mxu1 %v1772_v0  ;;  %1552 = vmatprep.subr.bf16.mxu0 %v1772_v0 }
  0x20   :  { %1506 = vmatpush3.bf16.msra.mxu1 %v1902_v25  ;;  %1554 = vmatpush3.bf16.msra.mxu0 %v1902_v25 }
  0x21   :  { %1507 = vmatprep.subr.bf16.mxu1 %v1772_v0  ;;  %1579 = vmatprep.subr.bf16.mxu0 %v1772_v0 }
  0x23   :  { %1166 = vmatmul.mubr.f32.vlgmr.msra.gmra.mrb[0].mxu1 %v1774_v4 }
  0x24   :  { %1509 = vmatpush3.bf16.msra.mxu1 %v1821_v5  ;;  %1200 = vmatprep.mubr.msk.f32.mxu1 %vm1773_vm0, %v1774_v4 }
  0x25   :  { %1510 = vmatprep.subr.bf16.mxu1 %v1772_v0 }
  0x28   :  { %1512 = vmatpush3.bf16.msra.mxu1 %v1830_v7 }
  0x29   :  { %1513 = vmatprep.subr.bf16.mxu1 %v1772_v0 }
  0x2c   :  { %1515 = vmatpush3.bf16.msra.mxu1 %v1842_v10 }
  0x2d   :  { %1516 = vmatprep.subr.bf16.mxu1 %v1772_v0 }
  0x30   :  { %1518 = vmatpush3.bf16.msra.mxu1 %v1854_v13 }
  0x31   :  { %1519 = vmatprep.subr.bf16.mxu1 %v1772_v0 }
  0x34   :  { %1521 = vmatpush3.bf16.msra.mxu1 %v1866_v16 }
  0x35   :  { %1522 = vmatprep.subr.bf16.mxu1 %v1772_v0 }
  0x38   :  { %1524 = vmatpush3.bf16.msra.mxu1 %v1878_v19 }
  0x39   :  { %1525 = vmatprep.subr.bf16.mxu1 %v1772_v0 }
  0x3c   :  { %1527 = vmatpush3.bf16.msra.mxu1 %v1890_v22 }
  0x3d   :  { %1528 = vmatprep.subr.bf16.mxu1 %v1772_v0 }
  0x40   :  { %1530 = vmatpush3.bf16.msra.mxu1 %v1902_v25 }
  0x41   :  { %1555 = vmatprep.subr.bf16.mxu1 %v1772_v0 }
  0xf6   :  { %v113_v28 = vpop.f32.mrb[0].mxu1 }
  0xf7   :  { %v117_v29 = vadd.f32 %v113_v28, %v46_v27  ;;  %v1167_v30 = vpop.f32.mrb[1].mxu1 }
  0xf9   :  { %1732 = vtanh.f32 %v117_v29 }
 0x103   :  { %v1733_v34 = vpop.eup %1732 }
 0x104   :  { %v119_v36 = vmul.f32 %v1733_v34, %v1937_v33 }
 0x106   :  { %v120_v37 = vadd.f32 %v119_v36, %v1939_v35 }
 0x108   :  { %126 = vrot.lane.b32.xlu1 %v120_v37, %s1776_s26  ;;  %121 = vrot.lane.b32.xlu0 %v120_v37, %s1777_s27  ;;  %v128_v41 = vmul.f32 0.0, %v120_v37 }
 0x10c   :  { %123 = vrot.lane.b32.xlu0 %v120_v37, %s1778_s28 }
 0x17a   :  { %v122_v38 = vpop.permute.xlu0 %121  ;;  %v127_v44 = vpop.permute.xlu1 %126 }
 0x17e   :  { %v124_v39 = vpop.permute.xlu0 %123 }
 0x17f   :  { %v125_v40 = vmul.f32 %v124_v39, %v122_v38 }
 0x181   :  { %v129_v42 = vadd.f32 %v128_v41, %v125_v40  ;;  %v390_v40 = vld [vmem:[%s2241_s0 + $0x40] sm:$0xff] }
 0x183   :  { %1734 = vtanh.f32 %v129_v42 }
 0x18d   :  { %v1735_v43 = vpop.eup %1734 }
 0x18e   :  { %v131_v45 = vmul.f32 %v1735_v43, %v127_v44 }
 0x190   :  { %1201 = vmatmul.mubr.f32.vlgmr.msra.gmra.mrb[2].mxu1 %v131_v45 }
 0x191   :  { %1557 = vmatpush3.bf16.msra.mxu1 %v1821_v5  ;;  %1270 = vmatprep.mubr.msk.f32.mxu1 %vm1773_vm0, %v1774_v4 }
 0x192   :  { %1558 = vmatprep.subr.bf16.mxu1 %v1772_v0 }
 0x195   :  { %1560 = vmatpush3.bf16.msra.mxu1 %v1830_v7 }
 0x196   :  { %1561 = vmatprep.subr.bf16.mxu1 %v1772_v0 }
 0x199   :  { %1563 = vmatpush3.bf16.msra.mxu1 %v1842_v10 }
 0x19a   :  { %1564 = vmatprep.subr.bf16.mxu1 %v1772_v0 }
 0x19d   :  { %1566 = vmatpush3.bf16.msra.mxu1 %v1854_v13 }
 0x19e   :  { %1567 = vmatprep.subr.bf16.mxu1 %v1772_v0 }
 0x1a1   :  { %1569 = vmatpush3.bf16.msra.mxu1 %v1866_v16 }
 0x1a2   :  { %1570 = vmatprep.subr.bf16.mxu1 %v1772_v0 }
 0x1a5   :  { %1572 = vmatpush3.bf16.msra.mxu1 %v1878_v19 }
 0x1a6   :  { %1573 = vmatprep.subr.bf16.mxu1 %v1772_v0 }
 0x1a9   :  { %1575 = vmatpush3.bf16.msra.mxu1 %v1890_v22 }
 0x1aa   :  { %1576 = vmatprep.subr.bf16.mxu1 %v1772_v0 }
 0x1ad   :  { %1578 = vmatpush3.bf16.msra.mxu1 %v1902_v25 }
 0x1ae   :  { %1603 = vmatprep.subr.bf16.mxu1 %v1772_v0 }
 0x263   :  { %v199_v47 = vpop.f32.mrb[2].mxu1 }
 0x264   :  { %v203_v48 = vadd.f32 %v199_v47, %v132_v46  ;;  %v1202_v49 = vpop.f32.mrb[3].mxu1 }
 0x266   :  { %1736 = vtanh.f32 %v203_v48 }
 0x270   :  { %v1737_v50 = vpop.eup %1736 }
 0x271   :  { %v205_v51 = vmul.f32 %v1737_v50, %v1937_v33 }
 0x273   :  { %v206_v52 = vadd.f32 %v205_v51, %v1939_v35 }
 0x275   :  { %209 = vrot.lane.b32.xlu0 %v206_v52, %s1778_s28  ;;  %207 = vrot.lane.b32.xlu1 %v206_v52, %s1777_s27  ;;  %v214_v56 = vmul.f32 %v206_v52, %v129_v42 }
 0x279   :  { %212 = vrot.lane.b32.xlu1 %v206_v52, %s1776_s26 }
 0x2e7   :  { %v210_v53 = vpop.permute.xlu0 %209  ;;  %v208_v54 = vpop.permute.xlu1 %207 }
 0x2e8   :  { %v211_v55 = vmul.f32 %v210_v53, %v208_v54 }
 0x2ea   :  { %v215_v57 = vadd.f32 %v214_v56, %v211_v55 }
 0x2eb   :  { %v213_v59 = vpop.permute.xlu1 %212 }
 0x2ec   :  { %1738 = vtanh.f32 %v215_v57 }
 0x2f6   :  { %v1739_v58 = vpop.eup %1738 }
 0x2f7   :  { %v217_v60 = vmul.f32 %v1739_v58, %v213_v59 }
 0x2f9   :  { %1236 = vmatmul.mubr.f32.vlgmr.msra.gmra.mrb[0].mxu0 %v217_v60 }
 0x2fa   :  { %1581 = vmatpush3.bf16.msra.mxu0 %v1821_v5  ;;  %1305 = vmatprep.mubr.msk.f32.mxu0 %vm1773_vm0, %v1774_v4 }
 0x2fb   :  { %1582 = vmatprep.subr.bf16.mxu0 %v1772_v0 }
 0x2fe   :  { %1584 = vmatpush3.bf16.msra.mxu0 %v1830_v7 }
 0x2ff   :  { %1585 = vmatprep.subr.bf16.mxu0 %v1772_v0 }
 0x302   :  { %1587 = vmatpush3.bf16.msra.mxu0 %v1842_v10 }
 0x303   :  { %1588 = vmatprep.subr.bf16.mxu0 %v1772_v0 }
 0x306   :  { %1590 = vmatpush3.bf16.msra.mxu0 %v1854_v13 }
 0x307   :  { %1591 = vmatprep.subr.bf16.mxu0 %v1772_v0 }
 0x30a   :  { %1593 = vmatpush3.bf16.msra.mxu0 %v1866_v16 }
 0x30b   :  { %1594 = vmatprep.subr.bf16.mxu0 %v1772_v0 }
 0x30e   :  { %1596 = vmatpush3.bf16.msra.mxu0 %v1878_v19 }
 0x30f   :  { %1597 = vmatprep.subr.bf16.mxu0 %v1772_v0 }
 0x312   :  { %1599 = vmatpush3.bf16.msra.mxu0 %v1890_v22 }
 0x313   :  { %1600 = vmatprep.subr.bf16.mxu0 %v1772_v0 }
 0x316   :  { %1602 = vmatpush3.bf16.msra.mxu0 %v1902_v25 }
 0x317   :  { %1627 = vmatprep.subr.bf16.mxu0 %v1772_v0 }
 0x3cc   :  { %v285_v62 = vpop.f32.mrb[0].mxu0 }
 0x3cd   :  { %v289_v63 = vadd.f32 %v285_v62, %v218_v61  ;;  %v1237_v1 = vpop.f32.mrb[1].mxu0  ;;  %v562_v62 = vld [vmem:[%s2241_s0 + $0x60] sm:$0xff] }
 0x3cf   :  { %1740 = vtanh.f32 %v289_v63 }
 0x3d9   :  { %v1741_v2 = vpop.eup %1740 }
 0x3da   :  { %v291_v3 = vmul.f32 %v1741_v2, %v1937_v33 }
 0x3dc   :  { %v292_v6 = vadd.f32 %v291_v3, %v1939_v35 }
 0x3de   :  { %295 = vrot.lane.b32.xlu1 %v292_v6, %s1778_s28  ;;  %293 = vrot.lane.b32.xlu0 %v292_v6, %s1777_s27  ;;  %v300_v12 = vmul.f32 %v292_v6, %v215_v57 }
 0x3e2   :  { %298 = vrot.lane.b32.xlu0 %v292_v6, %s1776_s26 }
 0x450   :  { %v296_v8 = vpop.permute.xlu1 %295  ;;  %v294_v9 = vpop.permute.xlu0 %293 }
 0x451   :  { %v297_v11 = vmul.f32 %v296_v8, %v294_v9 }
 0x453   :  { %v301_v14 = vadd.f32 %v300_v12, %v297_v11 }
 0x454   :  { %v299_v17 = vpop.permute.xlu0 %298 }
 0x455   :  { %1742 = vtanh.f32 %v301_v14 }
 0x45f   :  { %v1743_v15 = vpop.eup %1742 }
 0x460   :  { %v303_v18 = vmul.f32 %v1743_v15, %v299_v17 }
 0x462   :  { %1271 = vmatmul.mubr.f32.vlgmr.msra.gmra.mrb[4].mxu1 %v303_v18 }
 0x463   :  { %1605 = vmatpush3.bf16.msra.mxu1 %v1821_v5  ;;  %1340 = vmatprep.mubr.msk.f32.mxu1 %vm1773_vm0, %v1774_v4 }
 0x464   :  { %1606 = vmatprep.subr.bf16.mxu1 %v1772_v0 }
 0x467   :  { %1608 = vmatpush3.bf16.msra.mxu1 %v1830_v7 }
 0x468   :  { %1609 = vmatprep.subr.bf16.mxu1 %v1772_v0 }
 0x46b   :  { %1611 = vmatpush3.bf16.msra.mxu1 %v1842_v10 }
 0x46c   :  { %1612 = vmatprep.subr.bf16.mxu1 %v1772_v0 }
 0x46f   :  { %1614 = vmatpush3.bf16.msra.mxu1 %v1854_v13 }
 0x470   :  { %1615 = vmatprep.subr.bf16.mxu1 %v1772_v0 }
 0x473   :  { %1617 = vmatpush3.bf16.msra.mxu1 %v1866_v16 }
 0x474   :  { %1618 = vmatprep.subr.bf16.mxu1 %v1772_v0 }
 0x477   :  { %1620 = vmatpush3.bf16.msra.mxu1 %v1878_v19 }
 0x478   :  { %1621 = vmatprep.subr.bf16.mxu1 %v1772_v0 }
 0x47b   :  { %1623 = vmatpush3.bf16.msra.mxu1 %v1890_v22 }
 0x47c   :  { %1624 = vmatprep.subr.bf16.mxu1 %v1772_v0 }
 0x47f   :  { %1626 = vmatpush3.bf16.msra.mxu1 %v1902_v25 }
 0x480   :  { %1651 = vmatprep.subr.bf16.mxu1 %v1772_v0 }
 0x535   :  { %v371_v21 = vpop.f32.mrb[4].mxu1 }
 0x536   :  { %v375_v23 = vadd.f32 %v371_v21, %v304_v20  ;;  %v1272_v24 = vpop.f32.mrb[5].mxu1  ;;  %v648_v21 = vld [vmem:[%s2241_s0 + $0x70] sm:$0xff] }
 0x538   :  { %1744 = vtanh.f32 %v375_v23  ;;  %v734_v23 = vld [vmem:[%s2241_s0 + $0x78] sm:$0xff] }
 0x542   :  { %v1745_v26 = vpop.eup %1744 }
 0x543   :  { %v377_v27 = vmul.f32 %v1745_v26, %v1937_v33 }
 0x545   :  { %v378_v28 = vadd.f32 %v377_v27, %v1939_v35 }
 0x547   :  { %381 = vrot.lane.b32.xlu0 %v378_v28, %s1778_s28  ;;  %379 = vrot.lane.b32.xlu1 %v378_v28, %s1777_s27  ;;  %v386_v34 = vmul.f32 %v378_v28, %v301_v14 }
 0x54b   :  { %384 = vrot.lane.b32.xlu1 %v378_v28, %s1776_s26 }
 0x5b9   :  { %v382_v29 = vpop.permute.xlu0 %381  ;;  %v380_v30 = vpop.permute.xlu1 %379 }
 0x5ba   :  { %v383_v32 = vmul.f32 %v382_v29, %v380_v30 }
 0x5bc   :  { %v387_v36 = vadd.f32 %v386_v34, %v383_v32 }
 0x5bd   :  { %v385_v38 = vpop.permute.xlu1 %384 }
 0x5be   :  { %1746 = vtanh.f32 %v387_v36 }
 0x5c8   :  { %v1747_v37 = vpop.eup %1746 }
 0x5c9   :  { %v389_v39 = vmul.f32 %v1747_v37, %v385_v38  ;;  %v789_v37 = vld [vmem:[%s2242_s3 + $0x8] sm:$0xff] }
 0x5cb   :  { %1306 = vmatmul.mubr.f32.vlgmr.msra.gmra.mrb[2].mxu0 %v389_v39  ;;  %v791_v39 = vld [vmem:[%s2242_s3 + $0x18] sm:$0xff] }
 0x5cc   :  { %1629 = vmatpush3.bf16.msra.mxu0 %v1821_v5  ;;  %1375 = vmatprep.mubr.msk.f32.mxu0 %vm1773_vm0, %v1774_v4 }
 0x5cd   :  { %1630 = vmatprep.subr.bf16.mxu0 %v1772_v0 }
 0x5d0   :  { %1632 = vmatpush3.bf16.msra.mxu0 %v1830_v7 }
 0x5d1   :  { %1633 = vmatprep.subr.bf16.mxu0 %v1772_v0 }
 0x5d4   :  { %1635 = vmatpush3.bf16.msra.mxu0 %v1842_v10 }
 0x5d5   :  { %1636 = vmatprep.subr.bf16.mxu0 %v1772_v0 }
 0x5d8   :  { %1638 = vmatpush3.bf16.msra.mxu0 %v1854_v13 }
 0x5d9   :  { %1639 = vmatprep.subr.bf16.mxu0 %v1772_v0 }
 0x5dc   :  { %1641 = vmatpush3.bf16.msra.mxu0 %v1866_v16 }
 0x5dd   :  { %1642 = vmatprep.subr.bf16.mxu0 %v1772_v0 }
 0x5e0   :  { %1644 = vmatpush3.bf16.msra.mxu0 %v1878_v19 }
 0x5e1   :  { %1645 = vmatprep.subr.bf16.mxu0 %v1772_v0 }
 0x5e4   :  { %1647 = vmatpush3.bf16.msra.mxu0 %v1890_v22 }
 0x5e5   :  { %1648 = vmatprep.subr.bf16.mxu0 %v1772_v0 }
 0x5e8   :  { %1650 = vmatpush3.bf16.msra.mxu0 %v1902_v25 }
 0x5e9   :  { %1675 = vmatprep.subr.bf16.mxu0 %v1772_v0 }
 0x69e   :  { %v457_v41 = vpop.f32.mrb[2].mxu0 }
 0x69f   :  { %v461_v42 = vadd.f32 %v457_v41, %v390_v40  ;;  %v1307_v43 = vpop.f32.mrb[3].mxu0  ;;  %v792_v41 = vld [vmem:[%s2242_s3 + $0x20] sm:$0xff] }
 0x6a1   :  { %1748 = vtanh.f32 %v461_v42  ;;  %v793_v42 = vld [vmem:[%s2242_s3 + $0x28] sm:$0xff] }
 0x6a2   :  { %v1682_v43 = vpack.c.bf16 %v793_v42, %v792_v41  ;;  %v784_v42 = vld [vmem:[%s2243_s2 + $0x60] sm:$0xff] }
 0x6ab   :  { %v1749_v44 = vpop.eup %1748 }
 0x6ac   :  { %v463_v45 = vmul.f32 %v1749_v44, %v1937_v33  ;;  %v794_v44 = vld [vmem:[%s2242_s3 + $0x30] sm:$0xff] }
 0x6ae   :  { %v464_v46 = vadd.f32 %v463_v45, %v1939_v35  ;;  %v795_v45 = vld [vmem:[%s2242_s3 + $0x38] sm:$0xff] }
 0x6b0   :  { %467 = vrot.lane.b32.xlu1 %v464_v46, %s1778_s28  ;;  %465 = vrot.lane.b32.xlu0 %v464_v46, %s1777_s27  ;;  %v472_v50 = vmul.f32 %v464_v46, %v387_v36 }
 0x6b4   :  { %470 = vrot.lane.b32.xlu0 %v464_v46, %s1776_s26  ;;  %v1685_v46 = vpack.c.bf16 %v795_v45, %v794_v44  ;;  %v786_v45 = vld [vmem:[%s2243_s2 + $0x70] sm:$0xff] }
 0x722   :  { %v468_v47 = vpop.permute.xlu1 %467  ;;  %v466_v48 = vpop.permute.xlu0 %465 }
 0x723   :  { %v469_v49 = vmul.f32 %v468_v47, %v466_v48  ;;  %v796_v47 = vld [vmem:[%s2242_s3 + $0x40] sm:$0xff]  ;;  %v797_v48 = vld [vmem:[%s2242_s3 + $0x48] sm:$0xff] }
 0x725   :  { %v473_v51 = vadd.f32 %v472_v50, %v469_v49  ;;  %v1688_v49 = vpack.c.bf16 %v797_v48, %v796_v47  ;;  %v798_v50 = vld [vmem:[%s2242_s3 + $0x50] sm:$0xff] }
 0x726   :  { %v471_v53 = vpop.permute.xlu0 %470 }
 0x727   :  { %1750 = vtanh.f32 %v473_v51 }
 0x731   :  { %v1751_v52 = vpop.eup %1750 }
 0x732   :  { %v475_v54 = vmul.f32 %v1751_v52, %v471_v53  ;;  %v800_v53 = vld [vmem:[%s2242_s3 + $0x60] sm:$0xff] }
 0x734   :  { %1341 = vmatmul.mubr.f32.vlgmr.msra.gmra.mrb[6].mxu1 %v475_v54  ;;  %v801_v54 = vld [vmem:[%s2242_s3 + $0x68] sm:$0xff] }
 0x735   :  { %1653 = vmatpush3.bf16.msra.mxu1 %v1821_v5  ;;  %1410 = vmatprep.mubr.msk.f32.mxu1 %vm1773_vm0, %v1774_v4  ;;  %v476_v5 = vld [vmem:[%s2241_s0 + $0x50] sm:$0xff] }
 0x736   :  { %1654 = vmatprep.subr.bf16.mxu1 %v1772_v0 }
 0x739   :  { %1656 = vmatpush3.bf16.msra.mxu1 %v1830_v7 }
 0x73a   :  { %1657 = vmatprep.subr.bf16.mxu1 %v1772_v0 }
 0x73d   :  { %1659 = vmatpush3.bf16.msra.mxu1 %v1842_v10 }
 0x73e   :  { %1660 = vmatprep.subr.bf16.mxu1 %v1772_v0 }
 0x741   :  { %1662 = vmatpush3.bf16.msra.mxu1 %v1854_v13 }
 0x742   :  { %1663 = vmatprep.subr.bf16.mxu1 %v1772_v0 }
 0x745   :  { %1665 = vmatpush3.bf16.msra.mxu1 %v1866_v16 }
 0x746   :  { %1666 = vmatprep.subr.bf16.mxu1 %v1772_v0 }
 0x749   :  { %1668 = vmatpush3.bf16.msra.mxu1 %v1878_v19 }
 0x74a   :  { %1669 = vmatprep.subr.bf16.mxu1 %v1772_v0 }
 0x74d   :  { %1671 = vmatpush3.bf16.msra.mxu1 %v1890_v22 }
 0x74e   :  { %1672 = vmatprep.subr.bf16.mxu1 %v1772_v0 }
 0x751   :  { %1674 = vmatpush3.bf16.msra.mxu1 %v1902_v25 }
 0x807   :  { %v543_v7 = vpop.f32.mrb[6].mxu1 }
 0x808   :  { %v547_v10 = vadd.f32 %v543_v7, %v476_v5  ;;  %v1342_v13 = vpop.f32.mrb[7].mxu1  ;;  %v1694_v5 = vpack.c.bf16 %v801_v54, %v800_v53 }
 0x80a   :  { %1752 = vtanh.f32 %v547_v10 }
 0x814   :  { %v1753_v16 = vpop.eup %1752 }
 0x815   :  { %v549_v55 = vmul.f32 %v1753_v16, %v1937_v33 }
 0x817   :  { %v550_v19 = vadd.f32 %v549_v55, %v1939_v35 }
 0x819   :  { %553 = vrot.lane.b32.xlu0 %v550_v19, %s1778_s28  ;;  %551 = vrot.lane.b32.xlu1 %v550_v19, %s1777_s27  ;;  %v558_v57 = vmul.f32 %v550_v19, %v473_v51  ;;  %v799_v51 = vld [vmem:[%s2242_s3 + $0x58] sm:$0xff] }
 0x81a   :  { %v1691_v52 = vpack.c.bf16 %v799_v51, %v798_v50 }
 0x81d   :  { %556 = vrot.lane.b32.xlu1 %v550_v19, %s1776_s26 }
 0x88b   :  { %v554_v22 = vpop.permute.xlu0 %553  ;;  %v552_v25 = vpop.permute.xlu1 %551 }
 0x88c   :  { %v555_v56 = vmul.f32 %v554_v22, %v552_v25 }
 0x88e   :  { %v559_v58 = vadd.f32 %v558_v57, %v555_v56 }
 0x88f   :  { %v557_v60 = vpop.permute.xlu1 %556 }
 0x890   :  { %1754 = vtanh.f32 %v559_v58 }
 0x89a   :  { %v1755_v59 = vpop.eup %1754 }
 0x89b   :  { %v561_v61 = vmul.f32 %v1755_v59, %v557_v60 }
 0x89d   :  { %1376 = vmatmul.mubr.f32.vlgmr.msra.gmra.mrb[4].mxu0 %v561_v61 }
 0x89e   :  { %1445 = vmatprep.mubr.msk.f32.mxu0 %vm1773_vm0, %v1774_v4 }
 0x970   :  { %v629_v63 = vpop.f32.mrb[4].mxu0 }
 0x971   :  { %v633_v1 = vadd.f32 %v629_v63, %v562_v62  ;;  %v1377_v2 = vpop.f32.mrb[5].mxu0 }
 0x973   :  { %1756 = vtanh.f32 %v633_v1 }
 0x97d   :  { %v1757_v3 = vpop.eup %1756 }
 0x97e   :  { %v635_v6 = vmul.f32 %v1757_v3, %v1937_v33 }
 0x980   :  { %v636_v8 = vadd.f32 %v635_v6, %v1939_v35  ;;  %v802_v6 = vld [vmem:[%s2242_s3 + $0x70] sm:$0xff] }
 0x982   :  { %639 = vrot.lane.b32.xlu1 %v636_v8, %s1778_s28  ;;  %637 = vrot.lane.b32.xlu0 %v636_v8, %s1777_s27  ;;  %v644_v14 = vmul.f32 %v636_v8, %v559_v58 }
 0x986   :  { %642 = vrot.lane.b32.xlu0 %v636_v8, %s1776_s26  ;;  %v1697_v8 = vpack.c.bf16 %v803_v31, %v802_v6 }
 0x9f4   :  { %v640_v9 = vpop.permute.xlu1 %639  ;;  %v638_v11 = vpop.permute.xlu0 %637 }
 0x9f5   :  { %v641_v12 = vmul.f32 %v640_v9, %v638_v11  ;;  %v772_v9 = vld [vmem:[%s2243_s2] sm:$0xff]  ;;  %v773_v11 = vld [vmem:[%s2243_s2 + $0x8] sm:$0xff] }
 0x9f7   :  { %v2085_v15 = vadd.f32 %v644_v14, %v641_v12 }
 0x9f8   :  { %v643_v18 = vpop.permute.xlu0 %642 }
 0x9f9   :  { %1758 = vtanh.f32 %v2085_v15 }
 0x9fa   :  { %1760 = vtanh.f32 %v734_v23 }
 0xa03   :  { %v1759_v17 = vpop.eup %1758 }
 0xa04   :  { %v647_v20 = vmul.f32 %v1759_v17, %v643_v18  ;;  %v1761_v28 = vpop.eup %1760 }
 0xa05   :  { %v736_v32 = vmul.f32 %v1761_v28, %v1937_v33 }
 0xa06   :  { %1411 = vmatmul.mubr.f32.vlgmr.msra.gmra.mrb[8].mxu1 %v647_v20  ;;  %v774_v20 = vld [vmem:[%s2243_s2 + $0x10] sm:$0xff] }
 0xa07   :  { %v737_v36 = vadd.f32 %v736_v32, %v1939_v35 }
 0xa09   :  { %v745_v19 = vmul.f32 0.0, %v737_v36 }
 0xad9   :  { %v715_v24 = vpop.f32.mrb[8].mxu1 }
 0xada   :  { %v719_v26 = vadd.f32 %v715_v24, %v648_v21  ;;  %v1412_v27 = vpop.f32.mrb[9].mxu1  ;;  %v775_v21 = vld [vmem:[%s2243_s2 + $0x18] sm:$0xff] }
 0xadc   :  { %1762 = vtanh.f32 %v719_v26  ;;  %v1703_v26 = vpack.c.bf16 %v775_v21, %v774_v20 }
 0xae6   :  { %v1763_v29 = vpop.eup %1762 }
 0xae7   :  { %v721_v30 = vmul.f32 %v1763_v29, %v1937_v33  ;;  %v788_v33 = vld [vmem:[%s2242_s3] sm:$0xff] }
 0xae8   :  { %v1676_v38 = vpack.c.bf16 %v789_v37, %v788_v33  ;;  %v776_v29 = vld [vmem:[%s2243_s2 + $0x20] sm:$0xff] }
 0xae9   :  { %v722_v34 = vadd.f32 %v721_v30, %v1939_v35  ;;  %v790_v35 = vld [vmem:[%s2242_s3 + $0x10] sm:$0xff]  ;;  %v777_v30 = vld [vmem:[%s2243_s2 + $0x28] sm:$0xff]  ;;  %v780_v37 = vld [vmem:[%s2243_s2 + $0x40] sm:$0xff] }
 0xaea   :  { %1677 = vmatpush3.bf16.msra.mxu0 %v1676_v38  ;;  %v1679_v40 = vpack.c.bf16 %v791_v39, %v790_v35  ;;  %v781_v35 = vld [vmem:[%s2243_s2 + $0x48] sm:$0xff]  ;;  %v782_v39 = vld [vmem:[%s2243_s2 + $0x50] sm:$0xff] }
 0xaeb   :  { %725 = vrot.lane.b32.xlu0 %v722_v34, %s1778_s28  ;;  %723 = vrot.lane.b32.xlu1 %v722_v34, %s1777_s27  ;;  %v730_v16 = vmul.f32 %v722_v34, %v2085_v15  ;;  %v1700_v15 = vpack.c.bf16 %v773_v11, %v772_v9  ;;  %v1712_v38 = vpack.c.bf16 %v781_v35, %v780_v37 }
 0xaec   :  { %1678 = vmatprep.subr.bf16.mxu0 %v1772_v0 }
 0xaee   :  { %1680 = vmatpush3.bf16.msra.mxu0 %v1679_v40  ;;  %v783_v40 = vld [vmem:[%s2243_s2 + $0x58] sm:$0xff] }
 0xaef   :  { %740 = vrot.lane.b32.xlu0 %v737_v36, %s1778_s28  ;;  %738 = vrot.lane.b32.xlu1 %v737_v36, %s1777_s27  ;;  %v1715_v41 = vpack.c.bf16 %v783_v40, %v782_v39 }
 0xaf0   :  { %1681 = vmatprep.subr.bf16.mxu0 %v1772_v0 }
 0xaf2   :  { %1683 = vmatpush3.bf16.msra.mxu0 %v1682_v43  ;;  %v785_v43 = vld [vmem:[%s2243_s2 + $0x68] sm:$0xff] }
 0xaf3   :  { %728 = vrot.lane.b32.xlu1 %v722_v34, %s1776_s26  ;;  %743 = vrot.lane.b32.xlu0 %v737_v36, %s1776_s26  ;;  %v1706_v34 = vpack.c.bf16 %v777_v30, %v776_v29  ;;  %v779_v36 = vld [vmem:[%s2243_s2 + $0x38] sm:$0xff]  ;;  %v1718_v44 = vpack.c.bf16 %v785_v43, %v784_v42 }
 0xaf4   :  { %1684 = vmatprep.subr.bf16.mxu0 %v1772_v0 }
 0xaf6   :  { %1686 = vmatpush3.bf16.msra.mxu0 %v1685_v46  ;;  %v787_v46 = vld [vmem:[%s2243_s2 + $0x78] sm:$0xff] }
 0xaf7   :  { %1687 = vmatprep.subr.bf16.mxu0 %v1772_v0  ;;  %v1721_v47 = vpack.c.bf16 %v787_v46, %v786_v45 }
 0xafa   :  { %1689 = vmatpush3.bf16.msra.mxu0 %v1688_v49 }
 0xafb   :  { %1690 = vmatprep.subr.bf16.mxu0 %v1772_v0 }
 0xafe   :  { %1692 = vmatpush3.bf16.msra.mxu0 %v1691_v52 }
 0xaff   :  { %1693 = vmatprep.subr.bf16.mxu0 %v1772_v0 }
 0xb02   :  { %1695 = vmatpush3.bf16.msra.mxu0 %v1694_v5 }
 0xb03   :  { %1696 = vmatprep.subr.bf16.mxu0 %v1772_v0 }
 0xb06   :  { %1698 = vmatpush3.bf16.msra.mxu0 %v1697_v8 }
 0xb07   :  { %1699 = vmatprep.subr.bf16.mxu0 %v1772_v0 }
 0xb5d   :  { %v726_v7 = vpop.permute.xlu0 %725  ;;  %v724_v10 = vpop.permute.xlu1 %723 }
 0xb5e   :  { %v727_v13 = vmul.f32 %v726_v7, %v724_v10 }
 0xb60   :  { %v731_v55 = vadd.f32 %v730_v16, %v727_v13 }
 0xb61   :  { %v741_v22 = vpop.permute.xlu0 %740  ;;  %v739_v25 = vpop.permute.xlu1 %738 }
 0xb62   :  { %v742_v56 = vmul.f32 %v741_v22, %v739_v25  ;;  %1764 = vtanh.f32 %v731_v55 }
 0xb64   :  { %v746_v57 = vadd.f32 %v745_v19, %v742_v56 }
 0xb65   :  { %v744_v59 = vpop.permute.xlu0 %743  ;;  %v729_v61 = vpop.permute.xlu1 %728 }
 0xb66   :  { %1766 = vtanh.f32 %v746_v57 }
 0xb6c   :  { %v1765_v58 = vpop.eup %1764 }
 0xb6d   :  { %v733_v62 = vmul.f32 %v1765_v58, %v729_v61 }
 0xb70   :  { %v1767_v60 = vpop.eup %1766 }
 0xb71   :  { %v748_v63 = vmul.f32 %v1767_v60, %v744_v59 }
 0xb73   :  { %v749_v2 = vadd.f32 %v748_v63, %v733_v62 }
 0xb75   :  { %v750_v3 = vsel %vm2156_vm6, %v749_v2, 0.0 }
 0xb76   :  { %751 = vadd.xlane.f32.xlu1 %v750_v3 }
 0xc03   :  { %v752_v12 = vpop.xlane.xlu1 %751 }
 0xc04   :  { %v753_v14 = vmul.f32 0.015625, %v752_v12 }
 0xc06   :  { %v754_v17 = vsub.f32 %v733_v62, %v753_v14  ;;  %v756_v18 = vsub.f32 %v748_v63, %v753_v14 }
 0xc08   :  { %1446 = vmatmul.mubr.msk.f32.vlgmr.msra.gmra.mrb[6].mxu0 %vm2156_vm6, %v756_v18  ;;  %v755_v23 = vsel %vm2156_vm6, %v754_v17, 0.0  ;;  %v757_v24 = vsel %vm2156_vm6, %v756_v18, 0.0 }
 0xc09   :  { %1701 = vmatpush3.bf16.msra.mxu0 %v1700_v15  ;;  %v758_v27 = vmul.f32 %v755_v23, %v755_v23  ;;  %v759_v28 = vmul.f32 %v757_v24, %v757_v24  ;;  %1480 = vmatprep.mubr.msk.f32.mxu0 %vm1773_vm0, %v1774_v4  ;;  %v778_v4 = vld [vmem:[%s2243_s2 + $0x30] sm:$0xff] }
 0xc0a   :  { %1702 = vmatprep.subr.bf16.mxu0 %v1772_v0  ;;  %v1709_v33 = vpack.c.bf16 %v779_v36, %v778_v4 }
 0xc0b   :  { %v760_v32 = vadd.f32 %v759_v28, %v758_v27 }
 0xc0d   :  { %1704 = vmatpush3.bf16.msra.mxu0 %v1703_v26  ;;  %761 = vadd.xlane.f32.xlu0 %v760_v32 }
 0xc0e   :  { %1705 = vmatprep.subr.bf16.mxu0 %v1772_v0 }
 0xc11   :  { %1707 = vmatpush3.bf16.msra.mxu0 %v1706_v34 }
 0xc12   :  { %1708 = vmatprep.subr.bf16.mxu0 %v1772_v0 }
 0xc15   :  { %1710 = vmatpush3.bf16.msra.mxu0 %v1709_v33 }
 0xc16   :  { %1711 = vmatprep.subr.bf16.mxu0 %v1772_v0 }
 0xc19   :  { %1713 = vmatpush3.bf16.msra.mxu0 %v1712_v38 }
 0xc1a   :  { %1714 = vmatprep.subr.bf16.mxu0 %v1772_v0 }
 0xc1d   :  { %1716 = vmatpush3.bf16.msra.mxu0 %v1715_v41 }
 0xc1e   :  { %1717 = vmatprep.subr.bf16.mxu0 %v1772_v0 }
 0xc21   :  { %1719 = vmatpush3.bf16.msra.mxu0 %v1718_v44 }
 0xc22   :  { %1720 = vmatprep.subr.bf16.mxu0 %v1772_v0  ;;  %v962_v0 = vld [vmem:[%s2244_s4] ss:$0 sm:$0xff] }
 0xc25   :  { %1722 = vmatpush3.bf16.msra.mxu0 %v1721_v47 }
 0xc28   :  { %1481 = vmatmul.mubr.msk.f32.vlgmr.msra.gmra.mrb[6].mxu0 %vm2156_vm6, %v754_v17 }
 0xc9a   :  { %v762_v48 = vpop.xlane.xlu0 %761 }
 0xc9b   :  { %v763_v49 = vmul.f32 0.015873017, %v762_v48 }
 0xc9d   :  { %1768 = vrsqrt.f32 %v763_v49  ;;  %vm766_vm7 = vcmp.eq.f32.partialorder %v763_v49, inf  ;;  %v769_v53 = vand.u32 2147483648, %v763_v49  ;;  %vm768_vm8 = vcmp.eq.f32.partialorder %v763_v49, 0.0 }
 0xca7   :  { %v1769_v50 = vpop.eup %1768 }
 0xca8   :  { %v765_v51 = vmul.f32 %v1769_v50, %v763_v49 }
 0xcaa   :  { %v767_v52 = vsel %vm766_vm7, %v763_v49, %v765_v51 }
 0xcab   :  { %v770_v54 = vsel %vm768_vm8, %v769_v53, %v767_v52 }
 0xcac   :  { %v771_v5 = vmax.f32 %v770_v54, 1e-06 }
 0xcae   :  { %1770 = vrcp.f32 %v771_v5 }
 0xcb8   :  { %v1771_v7 = vpop.eup %1770 }
 0xcfb   :  { %v940_v10 = vpop.f32.mrb[6].mxu0 }
 0xcfc   :  { %v946_v13 = vmul.f32 %v1771_v7, %v940_v10  ;;  %v1482_v16 = vpop.f32.mrb[7].mxu0 }
 0xcfe   :  { %v954_v55 = vadd.f32 %v962_v0, %v946_v13 }
 0xd00   :  { %955 = vst [vmem:[%s2245_s5] sm:$0xff] %v954_v55 }

</bundles_post_ra>
